<compile_context>
chip_gen: v5e
topology: v5e:2x2
jax: 0.10.0
libtpu: 0.0.40
codegen_flags: <defaults>
</compile_context>

<pallas_src>
import jax
import jax.numpy as jnp
from jax.experimental import pallas as pl
from jax.experimental.pallas import tpu as pltpu


# ---- packed-parameter slab layout (rows of a (272, 128) f32 array) ----------
_HP = 128                 # hidden / intermediate dims padded to full lane width
_XP = 8                   # n_states padded to 8 (K dim of the layer-1 MXU dot)
_OP = 8                   # n_actions padded to 8 output lanes (narrow writeback)
_W1_ROW = 0               # rows [0,   8)   : w1  (n_states x hidden), zero-padded
_W2_ROW = 8               # rows [8, 136)   : w2  (hidden  x hidden),  zero-padded
_W3_ROW = 136             # rows [136,264)  : w3  (hidden  x actions), zero-padded
_BIAS_ROW = 264           # row 264 = b1, 265 = b2, 266 = b3
_SLAB_ROWS = 272          # multiple of 8 sublanes

_TB_CAP = 256             # batch-tile cap (review: 256 is the spill-safe sweet spot)


def _round_up(x, m):
    return ((x + m - 1) // m) * m


def _mlp_kernel(x_ref, p_ref, o_ref):
    x = x_ref[...]                                   # (TB, 8) f32, lanes 4..7 zero

    b1 = p_ref[_BIAS_ROW + 0:_BIAS_ROW + 1, :]       # (1, 128)
    b2 = p_ref[_BIAS_ROW + 1:_BIAS_ROW + 2, :]
    b3 = p_ref[_BIAS_ROW + 2:_BIAS_ROW + 3, :]

    # ---- layer 1: single K=8 MXU pass (zero-padded rows/lanes are inert)
    w1 = p_ref[_W1_ROW:_W1_ROW + _XP, :]             # (8, 128)
    h1 = jnp.dot(x, w1, preferred_element_type=jnp.float32) + b1
    h1 = jnp.maximum(h1, 0.0)

    # ---- layer 2: 128x128, lane-dense
    w2 = p_ref[_W2_ROW:_W2_ROW + _HP, :]
    h2 = jnp.dot(h1, w2, preferred_element_type=jnp.float32) + b2
    h2 = jnp.maximum(h2, 0.0)

    # ---- layer 3: 128x128 dot, then narrow (8-lane) writeback
    w3 = p_ref[_W3_ROW:_W3_ROW + _HP, :]
    logits = jnp.dot(h2, w3, preferred_element_type=jnp.float32) + b3

    # TODO(synk): bf16 output store would halve writeback on v5e if downstream
    # tolerates it; kept f32 for exact parity with the PyTorch module.
    o_ref[...] = logits[:, :_OP]


def torch_model_forward(x, params):
    """Forward pass of TorchModel as a single fused Pallas kernel.

    x:      (B, n_states) float32
    params: dict from init_params (contains the packed "slab" plus metadata)
    returns (B, n_actions) float32 logits
    """
    slab = params["slab"]
    n_states = params["n_states"]
    n_actions = params["n_actions"]

    B = x.shape[0]
    if B == 0:
        return jnp.zeros((0, n_actions), jnp.float32)

    # Batch tile: single tile (rounded to 8 sublanes) up to 256 rows; beyond
    # that, 256-row tiles -> >= 2 grid steps, letting the "parallel" axis
    # shard across both TensorCores on v7x.
    TB = _TB_CAP if B > _TB_CAP else _round_up(B, 8)
    B_pad = _round_up(B, TB)

    # Pad batch rows to the tile multiple and feature lanes n_states -> 8
    # (one pad op; padded entries are zero and numerically inert).
    x = jnp.pad(x.astype(jnp.float32),
                ((0, B_pad - B), (0, _XP - n_states)))

    grid = (B_pad // TB,)

    out = pl.pallas_call(
        _mlp_kernel,
        out_shape=jax.ShapeDtypeStruct((B_pad, _OP), jnp.float32),
        grid_spec=pltpu.PrefetchScalarGridSpec(
            num_scalar_prefetch=0,
            grid=grid,
            in_specs=[
                pl.BlockSpec((TB, _XP), lambda i: (i, 0)),           # x tile
                pl.BlockSpec((_SLAB_ROWS, _HP), lambda i: (0, 0)),   # params (resident)
            ],
            out_specs=pl.BlockSpec((TB, _OP), lambda i: (i, 0)),
        ),
        compiler_params=pltpu.CompilerParams(
            dimension_semantics=("parallel",)),
    )(x, slab)

    # Padded rows/lanes are numerically inert; slice them off.
    return out[:B, :n_actions]


def init_params(key, n_states, n_actions, hidden_size=36):
    """PyTorch nn.Linear default init: U(-1/sqrt(fan_in), 1/sqrt(fan_in)).
    Weights kept as (in_features, out_features); additionally packed into one
    zero-padded (272, 128) slab so the kernel needs a single parameter DMA."""
    assert n_states <= _XP and hidden_size <= _HP and n_actions <= _OP

    keys = jax.random.split(key, 6)

    def linear(kw, kb, fan_in, fan_out):
        bound = 1.0 / jnp.sqrt(jnp.float32(fan_in))
        w = jax.random.uniform(kw, (fan_in, fan_out), jnp.float32, -bound, bound)
        b = jax.random.uniform(kb, (fan_out,), jnp.float32, -bound, bound)
        return w, b

    w1, b1 = linear(keys[0], keys[1], n_states, hidden_size)
    w2, b2 = linear(keys[2], keys[3], hidden_size, hidden_size)
    w3, b3 = linear(keys[4], keys[5], hidden_size, n_actions)

    slab = jnp.zeros((_SLAB_ROWS, _HP), jnp.float32)
    slab = slab.at[_W1_ROW:_W1_ROW + n_states, :hidden_size].set(w1)
    slab = slab.at[_W2_ROW:_W2_ROW + hidden_size, :hidden_size].set(w2)
    slab = slab.at[_W3_ROW:_W3_ROW + hidden_size, :n_actions].set(w3)
    slab = slab.at[_BIAS_ROW + 0, :hidden_size].set(b1)
    slab = slab.at[_BIAS_ROW + 1, :hidden_size].set(b2)
    slab = slab.at[_BIAS_ROW + 2, :n_actions].set(b3)

    return {
        "slab": slab,
        "n_states": n_states,
        "n_actions": n_actions,
        "hidden_size": hidden_size,
        # Unpacked copies kept only for the pure-JAX reference check.
        "w1": w1, "b1": b1, "w2": w2, "b2": b2, "w3": w3, "b3": b3,
    }


def _reference_forward(x, p):
    h1 = jnp.maximum(x @ p["w1"] + p["b1"], 0.0)
    h2 = jnp.maximum(h1 @ p["w2"] + p["b2"], 0.0)
    return h2 @ p["w3"] + p["b3"]


if __name__ == "__main__":
    n_states, n_actions, hidden = 4, 2, 36
    batch = 2

    key = jax.random.PRNGKey(0)
    k_params, k_x, k_x2 = jax.random.split(key, 3)

    params = init_params(k_params, n_states, n_actions, hidden)
    x = jax.random.normal(k_x, (batch, n_states), dtype=jnp.float32)

    logits = jax.block_until_ready(torch_model_forward(x, params))
    ref = _reference_forward(x, params)
    assert logits.shape == (batch, n_actions)
    assert jnp.allclose(logits, ref, atol=1e-5, rtol=1e-5)

    # Also exercise the multi-step-grid path (replay-buffer-sized batch, >256
    # rows -> two 256-row tiles, padded batch rows).
    x_big = jax.random.normal(k_x2, (300, n_states), dtype=jnp.float32)
    logits_big = jax.block_until_ready(torch_model_forward(x_big, params))
    ref_big = _reference_forward(x_big, params)
    assert logits_big.shape == (300, n_actions)
    assert jnp.allclose(logits_big, ref_big, atol=1e-4, rtol=1e-4)

    print("KERNEL_OK")
</pallas_src>

<mosaic_0001>
module attributes {stable_mosaic.version = 11 : i64} {
  func.func @_mlp_kernel(%arg0: i32, %arg1: memref<8x8xf32, #tpu.memory_space<vmem>>, %arg2: memref<272x128xf32, #tpu.memory_space<vmem>>, %arg3: memref<8x8xf32, #tpu.memory_space<vmem>>) attributes {dimension_semantics = [#tpu.dimension_semantics<parallel>], iteration_bounds = array<i64: 1>, scalar_prefetch = 0 : i64, scratch_operands = 0 : i64, tpu.core_type = #tpu.core_type<tc>, window_params = [{transform_indices = @transform_0, window_bounds = array<i64: 8, 8>}, {pipeline_mode = #tpu.pipeline_mode<synchronous>, transform_indices = @transform_1, window_bounds = array<i64: 272, 128>}, {transform_indices = @transform_2, window_bounds = array<i64: 8, 8>}]} {
    %c0 = arith.constant 0 : index
    %c0_0 = arith.constant 0 : index
    %0 = vector.load %arg1[%c0, %c0_0] : memref<8x8xf32, #tpu.memory_space<vmem>>, vector<8x8xf32>
    %c264 = arith.constant 264 : index
    %c0_1 = arith.constant 0 : index
    %1 = vector.load %arg2[%c264, %c0_1] : memref<272x128xf32, #tpu.memory_space<vmem>>, vector<1x128xf32>
    %c265 = arith.constant 265 : index
    %c0_2 = arith.constant 0 : index
    %2 = vector.load %arg2[%c265, %c0_2] : memref<272x128xf32, #tpu.memory_space<vmem>>, vector<1x128xf32>
    %c266 = arith.constant 266 : index
    %c0_3 = arith.constant 0 : index
    %3 = vector.load %arg2[%c266, %c0_3] : memref<272x128xf32, #tpu.memory_space<vmem>>, vector<1x128xf32>
    %c0_4 = arith.constant 0 : index
    %c0_5 = arith.constant 0 : index
    %4 = vector.load %arg2[%c0_4, %c0_5] : memref<272x128xf32, #tpu.memory_space<vmem>>, vector<8x128xf32>
    %cst = arith.constant dense<0.000000e+00> : vector<8x128xf32>
    %5 = tpu.matmul %0, %4, %cst {dimension_numbers = #tpu.dot_dimension_numbers<[1], [0], [0], [1], [0, 0, 1, 1], [], []>} : vector<8x8xf32>, vector<8x128xf32>, vector<8x128xf32> -> vector<8x128xf32>
    %6 = vector.broadcast %1 : vector<1x128xf32> to vector<8x128xf32>
    %7 = arith.addf %5, %6 : vector<8x128xf32>
    %cst_6 = arith.constant 0.000000e+00 : f32
    %8 = vector.broadcast %cst_6 : f32 to vector<8x128xf32>
    %9 = arith.maximumf %7, %8 : vector<8x128xf32>
    %c8 = arith.constant 8 : index
    %c0_7 = arith.constant 0 : index
    %10 = vector.load %arg2[%c8, %c0_7] : memref<272x128xf32, #tpu.memory_space<vmem>>, vector<128x128xf32>
    %cst_8 = arith.constant dense<0.000000e+00> : vector<8x128xf32>
    %11 = tpu.matmul %9, %10, %cst_8 {dimension_numbers = #tpu.dot_dimension_numbers<[1], [0], [0], [1], [0, 0, 1, 1], [], []>} : vector<8x128xf32>, vector<128x128xf32>, vector<8x128xf32> -> vector<8x128xf32>
    %12 = vector.broadcast %2 : vector<1x128xf32> to vector<8x128xf32>
    %13 = arith.addf %11, %12 : vector<8x128xf32>
    %cst_9 = arith.constant 0.000000e+00 : f32
    %14 = vector.broadcast %cst_9 : f32 to vector<8x128xf32>
    %15 = arith.maximumf %13, %14 : vector<8x128xf32>
    %c136 = arith.constant 136 : index
    %c0_10 = arith.constant 0 : index
    %16 = vector.load %arg2[%c136, %c0_10] : memref<272x128xf32, #tpu.memory_space<vmem>>, vector<128x128xf32>
    %cst_11 = arith.constant dense<0.000000e+00> : vector<8x128xf32>
    %17 = tpu.matmul %15, %16, %cst_11 {dimension_numbers = #tpu.dot_dimension_numbers<[1], [0], [0], [1], [0, 0, 1, 1], [], []>} : vector<8x128xf32>, vector<128x128xf32>, vector<8x128xf32> -> vector<8x128xf32>
    %18 = vector.broadcast %3 : vector<1x128xf32> to vector<8x128xf32>
    %19 = arith.addf %17, %18 : vector<8x128xf32>
    %20 = vector.extract_strided_slice %19 {offsets = [0, 0], sizes = [8, 8], strides = [1, 1]} : vector<8x128xf32> to vector<8x8xf32>
    %c0_12 = arith.constant 0 : index
    %c0_13 = arith.constant 0 : index
    %21 = vector.load %arg3[%c0_12, %c0_13] : memref<8x8xf32, #tpu.memory_space<vmem>>, vector<8x8xf32>
    tpu.vector_store %arg3[%c0_12, %c0_13], %20 {strides = array<i32>} : memref<8x8xf32, #tpu.memory_space<vmem>>, vector<8x8xf32>,
    return
  }
  func.func @transform_0(%arg0: i32) -> (i32, i32) {
    %c0_i32 = arith.constant 0 : i32
    %c0_i32_0 = arith.constant 0 : i32
    return %arg0, %c0_i32 : i32, i32
  }
  func.func @transform_1(%arg0: i32) -> (i32, i32) {
    %c0_i32 = arith.constant 0 : i32
    %c0_i32_0 = arith.constant 0 : i32
    %c0_i32_1 = arith.constant 0 : i32
    return %c0_i32, %c0_i32_0 : i32, i32
  }
  func.func @transform_2(%arg0: i32) -> (i32, i32) {
    %c0_i32 = arith.constant 0 : i32
    %c0_i32_0 = arith.constant 0 : i32
    return %arg0, %c0_i32 : i32, i32
  }
}

</mosaic_0001>

<bundles_post_ra>
// kernel: tpu_custom_call.1
= control target key start
LH: loop header
LB: loop body
LE: loop exit
PB: predicated region body
PF: predicated region fallthrough
CT: control target
= control target key end

     0   :  { %7 = vsyncpa [#allocation3], 0  ;;  %s285_s0 = inlined_call_operand.hbm [shape: f32[8,8], index: 0, kind: input, shape index: {}]   ;;  %s286_s1 = inlined_call_operand.hbm [shape: f32[272,128], index: 1, kind: input, shape index: {}]   ;;  %s287_s2 = inlined_call_operand.hbm [shape: f32[8,8], index: 2, kind: output, shape index: {}]  }
   0x1   :  { %8 = vsyncpa [#allocation6], 0 }
   0x2   :  { %9 = vsyncpa [#allocation4], 0  ;;  %s15_s11 = sshll.u32 %s285_s0, 4  ;;  %s254_s12 = smov [#allocation2]   ;;  %s16_s11 = int_to_ptr.hbm [resolvable:$true] %s15_s11 }
   0x3   :  { %s17_s13 = sshll.u32 %s254_s12, 4  ;;  %s25_s16 = sshll.u32 %s286_s1, 4  ;;  %s18_s13 = int_to_ptr.vmem [resolvable:$true] %s17_s13  ;;  %s26_s16 = int_to_ptr.hbm [resolvable:$true] %s25_s16 }
   0x4   :  { %20 = dma.hbm_to_vmem [thread:$0]  %s16_s11, 128, %s18_s13, [#allocation3]  }
   0x5   :  { %s255_s17 = smov [#allocation5]   ;;  %s256_s19 = smov 128  }
   0x6   :  { %s27_s18 = sshll.u32 %s255_s17, 4  ;;  %s257_s20 = smov 8   ;;  %s28_s18 = int_to_ptr.vmem [resolvable:$true] %s27_s18 }
   0x7   :  { %33 = dma.hbm_to_vmem [thread:$0]  %s26_s16, 4352, %s28_s18, [#allocation6], %s256_s19, %s256_s19, %s257_s20  }
   0x8   :  { %248 = dma.done.wait [#allocation3], 128  }
   0x9   :  { %249 = vsyncadd [#allocation3], 4294967168 }
   0xa   :  { %250 = dma.done.wait [#allocation6], 4352  }
   0xb   :  { %251 = vsyncadd [#allocation6], 4294962944  ;;  %vm48_vm0 = vcmask 64512   ;;  %v46_v0 = vld [vmem:[#allocation5] sm:$0xff]  ;;  %v42_v1 = vld [vmem:[#allocation2] sm:$0xff]  ;;  %s258_s0 = smov [#allocation7]  }
   0xc   :  { %v88_v2 = vld [vmem:[#allocation5 + $0x80] sm:$0xff]  ;;  %67 = vmatpush.msra.mxu0 %v46_v0  ;;  %v87_v3 = vld [vmem:[#allocation5 + $0x78] sm:$0xff]  ;;  %v86_v4 = vld [vmem:[#allocation5 + $0x70] sm:$0xff]  ;;  %s154_s1 = sshll.u32 %s258_s0, 4  ;;  %s156_s23 = sshll.u32 %s287_s2, 4  ;;  %s155_s1 = int_to_ptr.vmem [resolvable:$true] %s154_s1  ;;  %s157_s23 = int_to_ptr.hbm [resolvable:$true] %s156_s23 }
   0xd   :  { %90 = vmatpush.msra.mxu1 %v88_v2  ;;  %167 = vmatmul.msk.f32.vlgmr.msra.gmra.mxu0 %vm48_vm0, %v42_v1  ;;  %v85_v5 = vld [vmem:[#allocation5 + $0x68] sm:$0xff]  ;;  %v84_v6 = vld [vmem:[#allocation5 + $0x60] sm:$0xff]  ;;  %v83_v7 = vld [vmem:[#allocation5 + $0x58] sm:$0xff] }
   0xe   :  { %v82_v8 = vld [vmem:[#allocation5 + $0x50] sm:$0xff]  ;;  %v81_v9 = vld [vmem:[#allocation5 + $0x48] sm:$0xff]  ;;  %v80_v10 = vld [vmem:[#allocation5 + $0x40] sm:$0xff] }
   0xf   :  { %91 = vmatpush.msra.mxu1 %v87_v3  ;;  %v79_v11 = vld [vmem:[#allocation5 + $0x38] sm:$0xff]  ;;  %v78_v12 = vld [vmem:[#allocation5 + $0x30] sm:$0xff]  ;;  %v77_v13 = vld [vmem:[#allocation5 + $0x28] sm:$0xff] }
  0x10   :  { %v76_v14 = vld [vmem:[#allocation5 + $0x20] sm:$0xff]  ;;  %v75_v15 = vld [vmem:[#allocation5 + $0x18] sm:$0xff]  ;;  %v74_v16 = vld [vmem:[#allocation5 + $0x10] sm:$0xff] }
  0x11   :  { %92 = vmatpush.msra.mxu1 %v86_v4  ;;  %v73_v17 = vld [vmem:[#allocation5 + $0x8] sm:$0xff]  ;;  %v126_v18 = vld [vmem:[#allocation5 + $0x100] sm:$0xff]  ;;  %v125_v19 = vld [vmem:[#allocation5 + $0xf8] sm:$0xff] }
  0x12   :  { %128 = vmatpush.msra.mxu2 %v126_v18  ;;  %v124_v20 = vld [vmem:[#allocation5 + $0xf0] sm:$0xff]  ;;  %v123_v21 = vld [vmem:[#allocation5 + $0xe8] sm:$0xff]  ;;  %v122_v22 = vld [vmem:[#allocation5 + $0xe0] sm:$0xff] }
  0x13   :  { %93 = vmatpush.msra.mxu1 %v85_v5  ;;  %v121_v23 = vld [vmem:[#allocation5 + $0xd8] sm:$0xff]  ;;  %v120_v24 = vld [vmem:[#allocation5 + $0xd0] sm:$0xff]  ;;  %v119_v25 = vld [vmem:[#allocation5 + $0xc8] sm:$0xff] }
  0x14   :  { %129 = vmatpush.msra.mxu2 %v125_v19  ;;  %v118_v26 = vld [vmem:[#allocation5 + $0xc0] sm:$0xff]  ;;  %v117_v27 = vld [vmem:[#allocation5 + $0xb8] sm:$0xff]  ;;  %v116_v28 = vld [vmem:[#allocation5 + $0xb0] sm:$0xff] }
  0x15   :  { %94 = vmatpush.msra.mxu1 %v84_v6  ;;  %v115_v29 = vld [vmem:[#allocation5 + $0xa8] sm:$0xff]  ;;  %v114_v30 = vld [vmem:[#allocation5 + $0xa0] sm:$0xff]  ;;  %v113_v35 = vld [vmem:[#allocation5 + $0x98] sm:$0xff] }
  0x16   :  { %130 = vmatpush.msra.mxu2 %v124_v20  ;;  %v173_v31 = vld [vmem:[#allocation5 + $0x108] ss:$0 sm:$0xff]  ;;  %v112_v36 = vld [vmem:[#allocation5 + $0x90] sm:$0xff]  ;;  %v174_v38 = vld [vmem:[#allocation5 + $0x109] ss:$0 sm:$0xff] }
  0x17   :  { %95 = vmatpush.msra.mxu1 %v83_v7  ;;  %v111_v37 = vld [vmem:[#allocation5 + $0x88] sm:$0xff] }
  0x18   :  { %131 = vmatpush.msra.mxu2 %v123_v21  ;;  %v175_v42 = vld [vmem:[#allocation5 + $0x10a] ss:$0 sm:$0xff] }
  0x19   :  { %96 = vmatpush.msra.mxu1 %v82_v8 }
  0x1a   :  { %132 = vmatpush.msra.mxu2 %v122_v22 }
  0x1b   :  { %97 = vmatpush.msra.mxu1 %v81_v9 }
  0x1c   :  { %133 = vmatpush.msra.mxu2 %v121_v23 }
  0x1d   :  { %98 = vmatpush.msra.mxu1 %v80_v10 }
  0x1e   :  { %134 = vmatpush.msra.mxu2 %v120_v24 }
  0x1f   :  { %99 = vmatpush.msra.mxu1 %v79_v11 }
  0x20   :  { %135 = vmatpush.msra.mxu2 %v119_v25 }
  0x21   :  { %100 = vmatpush.msra.mxu1 %v78_v12 }
  0x22   :  { %136 = vmatpush.msra.mxu2 %v118_v26 }
  0x23   :  { %101 = vmatpush.msra.mxu1 %v77_v13 }
  0x24   :  { %137 = vmatpush.msra.mxu2 %v117_v27 }
  0x25   :  { %102 = vmatpush.msra.mxu1 %v76_v14 }
  0x26   :  { %138 = vmatpush.msra.mxu2 %v116_v28 }
  0x27   :  { %103 = vmatpush.msra.mxu1 %v75_v15 }
  0x28   :  { %139 = vmatpush.msra.mxu2 %v115_v29 }
  0x29   :  { %104 = vmatpush.msra.mxu1 %v74_v16 }
  0x2a   :  { %140 = vmatpush.msra.mxu2 %v114_v30 }
  0x2b   :  { %105 = vmatpush.msra.mxu1 %v73_v17 }
  0x2c   :  { %141 = vmatpush.msra.mxu2 %v113_v35 }
  0x2e   :  { %142 = vmatpush.msra.mxu2 %v112_v36 }
  0x30   :  { %143 = vmatpush.msra.mxu2 %v111_v37 }
  0x8a   :  { %v69_v32 = vpop.f32.mrf.mxu0 }
  0x8b   :  { %v70_v33 = vadd.f32 %v173_v31, %v69_v32 }
  0x8d   :  { %v72_v34 = vmax.f32 %v70_v33, 0.0 }
  0x8f   :  { %106 = vmatmul.f32.vlgmr.msra.gmra.mxu1 %v72_v34 }
 0x10c   :  { %v107_v39 = vpop.f32.mrf.mxu1 }
 0x10d   :  { %v108_v40 = vadd.f32 %v174_v38, %v107_v39 }
 0x10f   :  { %v110_v41 = vmax.f32 %v108_v40, 0.0 }
 0x111   :  { %144 = vmatmul.f32.vlgmr.msra.gmra.mxu2 %v110_v41 }
 0x194   :  { %v145_v43 = vpop.f32.mrf.mxu2 }
 0x195   :  { %v146_v44 = vadd.f32 %v175_v42, %v145_v43 }
 0x197   :  { %148 = vst.msk [vmem:[#allocation7] sm:$0xff] %vm48_vm0, %v146_v44 }
 0x198   :  { %159 = dma.vmem_to_hbm [thread:$0]  %s155_s1, 128, %s157_s23, [#allocation4]  }
 0x199   :  { %252 = dma.done.wait [#allocation4], 128  }
 0x19a   :  { %253 = vsyncadd [#allocation4], 4294967168 }
 0x19b   :  { %164 = vsyncpa [#allocation3], 1 }
 0x19c   :  { %165 = vsyncpa [#allocation6], 1 }
 0x19d   :  { %166 = vsyncpa [#allocation4], 1 }

</bundles_post_ra>
